<compile_context>
chip_gen: v7x
topology: tpu7x:2x2x1
jax: 0.10.0
libtpu: 0.0.40
codegen_flags: <defaults>
</compile_context>

<pallas_src>
import functools

import jax
import jax.numpy as jnp
import numpy as np
from jax.experimental import pallas as pl
from jax.experimental.pallas import tpu as pltpu

LANES = 128  # lane width for the lane-dense fused-label output slab


def _lstm_label_kernel(x_ref, wih_ref, whh_ref, b_ref, wl_ref, bl_ref, out_ref, *,
                       seq_len, batch_padded, hidden_size):
    S, Bp, H = seq_len, batch_padded, hidden_size

    # Hoisted input projection for ALL timesteps at once:
    #   (S*Bp, E) @ (E, 4H) + (1, 4H) -> (S*Bp, 4H)
    x_proj = (jnp.dot(x_ref[...], wih_ref[...],
                      preferred_element_type=jnp.float32)
              + b_ref[...])

    whh = whh_ref[...]  # (H, 4H), loaded once; stays VMEM-resident across the unroll

    # Constant lane-scale vector (hoisted out of the loop, no per-iter broadcast):
    # g-block lanes get a 2x pre-scale so one whole-vreg sigmoid serves all gates
    # (tanh(x) == 2*sigmoid(2x) - 1).
    lane = jax.lax.broadcasted_iota(jnp.int32, (Bp, 4 * H), 1)
    g_block = (lane >= 2 * H) & (lane < 3 * H)
    gate_scale = jnp.where(g_block, 2.0, 1.0).astype(jnp.float32)  # (Bp, 4H)

    # h, c live in vregs.
    h = jnp.zeros((Bp, H), jnp.float32)
    c = jnp.zeros((Bp, H), jnp.float32)

    # Fully-unrolled recurrence (S small & static); only h @ W_hh is serialized.
    for t in range(S):
        gates = (jnp.dot(h, whh, preferred_element_type=jnp.float32)
                 + x_proj[t * Bp:(t + 1) * Bp, :])      # sublane-aligned static slice
        s = jax.nn.sigmoid(gates * gate_scale)          # ONE EUP push for the whole vreg
        i = s[:, 0 * H:1 * H]
        f = s[:, 1 * H:2 * H]
        g = 2.0 * s[:, 2 * H:3 * H] - 1.0               # == tanh(gates_g)
        o = s[:, 3 * H:4 * H]
        c = f * c + i * g
        h = o * jnp.tanh(c)

    # Fused label head: (Bp, H) @ (H, 128) + (1, 128) -> unmasked lane-dense store.
    out = jnp.dot(h, wl_ref[...], preferred_element_type=jnp.float32) + bl_ref[...]
    out_ref[...] = out.astype(out_ref.dtype)


def lstm_label_forward(x, w_ih_t, w_hh_t, bias, w_l_t, b_l):
    """x: (S, B, E) f32. Returns (B, 1) f32 == MyModel.forward(input, B)."""
    S, B, E = x.shape
    H = w_hh_t.shape[0]
    assert w_ih_t.shape == (E, 4 * H)
    assert w_hh_t.shape == (H, 4 * H)
    assert bias.shape == (1, 4 * H)
    assert w_l_t.shape == (H, 1)
    assert b_l.shape == (1, 1)

    # Pad batch to the 8-sublane granularity so every timestep slice is vreg-aligned.
    Bp = ((B + 7) // 8) * 8
    if Bp != B:
        x = jnp.pad(x, ((0, 0), (0, Bp - B), (0, 0)))
    x2 = x.reshape(S * Bp, E)  # flatten in HBM (free); one well-shaped 2-D matmul in-kernel

    # Zero-pad the tiny label head to 128 lanes -> unmasked lane-dense kernel store.
    w_l_pad = jnp.zeros((H, LANES), jnp.float32).at[:, :1].set(w_l_t)
    b_l_pad = jnp.zeros((1, LANES), jnp.float32).at[:, :1].set(b_l)

    kernel = functools.partial(_lstm_label_kernel,
                               seq_len=S, batch_padded=Bp, hidden_size=H)

    out = pl.pallas_call(
        kernel,
        out_shape=jax.ShapeDtypeStruct((Bp, LANES), jnp.float32),
        in_specs=[
            pl.BlockSpec(memory_space=pltpu.MemorySpace.VMEM),  # x (S*Bp, E)
            pl.BlockSpec(memory_space=pltpu.MemorySpace.VMEM),  # W_ih^T (E, 4H)
            pl.BlockSpec(memory_space=pltpu.MemorySpace.VMEM),  # W_hh^T (H, 4H)
            pl.BlockSpec(memory_space=pltpu.MemorySpace.VMEM),  # bias (1, 4H)
            pl.BlockSpec(memory_space=pltpu.MemorySpace.VMEM),  # W_l^T padded (H, 128)
            pl.BlockSpec(memory_space=pltpu.MemorySpace.VMEM),  # b_l padded (1, 128)
        ],
        out_specs=pl.BlockSpec(memory_space=pltpu.MemorySpace.VMEM),
    )(x2, w_ih_t, w_hh_t, bias, w_l_pad, b_l_pad)

    # Padded batch rows and padded lanes are discarded here (padded rows are NOT
    # guaranteed zero after the recurrence, so we always slice to the real rows).
    return out[:B, :1]


def ref_forward(x, w_ih_t, w_hh_t, bias, w_l_t, b_l):
    """Pure-JAX reference matching nn.LSTM(1 layer) + nn.Linear."""
    S, B, E = x.shape
    H = w_hh_t.shape[0]

    def step(carry, x_t):
        h, c = carry
        gates = x_t @ w_ih_t + h @ w_hh_t + bias
        i = jax.nn.sigmoid(gates[:, 0 * H:1 * H])
        f = jax.nn.sigmoid(gates[:, 1 * H:2 * H])
        g = jnp.tanh(gates[:, 2 * H:3 * H])
        o = jax.nn.sigmoid(gates[:, 3 * H:4 * H])
        c = f * c + i * g
        h = o * jnp.tanh(c)
        return (h, c), None

    h0 = jnp.zeros((B, H), jnp.float32)
    c0 = jnp.zeros((B, H), jnp.float32)
    (h_final, _), _ = jax.lax.scan(step, (h0, c0), x)
    return h_final @ w_l_t + b_l


if __name__ == "__main__":
    # Shapes consistent with the module: batch=4 (module's batch_size),
    # seq=8, embedding_length=16, hidden_size=32.
    S, B, E, H = 8, 4, 16, 32

    key = jax.random.PRNGKey(0)
    kx, k1, k2, k3, k4, k5, k6 = jax.random.split(key, 7)

    # PyTorch-style uniform(-1/sqrt(H), 1/sqrt(H)) init, deterministic.
    bound = 1.0 / np.sqrt(H)
    w_ih_t = jax.random.uniform(k1, (E, 4 * H), jnp.float32, -bound, bound)
    w_hh_t = jax.random.uniform(k2, (H, 4 * H), jnp.float32, -bound, bound)
    b_ih = jax.random.uniform(k3, (4 * H,), jnp.float32, -bound, bound)
    b_hh = jax.random.uniform(k4, (4 * H,), jnp.float32, -bound, bound)
    bias = (b_ih + b_hh).reshape(1, 4 * H)
    w_l_t = jax.random.uniform(k5, (H, 1), jnp.float32, -bound, bound)
    b_l = jax.random.uniform(k6, (1, 1), jnp.float32, -bound, bound)

    x = jax.random.normal(kx, (S, B, E), jnp.float32)

    out = lstm_label_forward(x, w_ih_t, w_hh_t, bias, w_l_t, b_l)
    out = jax.block_until_ready(out)

    ref = jax.block_until_ready(ref_forward(x, w_ih_t, w_hh_t, bias, w_l_t, b_l))
    assert out.shape == (B, 1)
    np.testing.assert_allclose(np.asarray(out), np.asarray(ref), rtol=1e-5, atol=1e-5)

    print("KERNEL_OK")
</pallas_src>

<mosaic_0001>
module attributes {stable_mosaic.version = 11 : i64} {
  func.func @_lstm_label_kernel(%arg0: memref<64x16xf32, #tpu.memory_space<vmem>>, %arg1: memref<16x128xf32, #tpu.memory_space<vmem>>, %arg2: memref<32x128xf32, #tpu.memory_space<vmem>>, %arg3: memref<1x128xf32, #tpu.memory_space<vmem>>, %arg4: memref<32x128xf32, #tpu.memory_space<vmem>>, %arg5: memref<1x128xf32, #tpu.memory_space<vmem>>, %arg6: memref<8x128xf32, #tpu.memory_space<vmem>>) attributes {dimension_semantics = [], scalar_prefetch = 0 : i64, scratch_operands = 0 : i64, tpu.core_type = #tpu.core_type<tc>} {
    %c0 = arith.constant 0 : index
    %c0_0 = arith.constant 0 : index
    %0 = vector.load %arg0[%c0, %c0_0] : memref<64x16xf32, #tpu.memory_space<vmem>>, vector<64x16xf32>
    %c0_1 = arith.constant 0 : index
    %c0_2 = arith.constant 0 : index
    %1 = vector.load %arg1[%c0_1, %c0_2] : memref<16x128xf32, #tpu.memory_space<vmem>>, vector<16x128xf32>
    %cst = arith.constant dense<0.000000e+00> : vector<64x128xf32>
    %2 = tpu.matmul %0, %1, %cst {dimension_numbers = #tpu.dot_dimension_numbers<[1], [0], [0], [1], [0, 0, 1, 1], [], []>} : vector<64x16xf32>, vector<16x128xf32>, vector<64x128xf32> -> vector<64x128xf32>
    %c0_3 = arith.constant 0 : index
    %c0_4 = arith.constant 0 : index
    %3 = vector.load %arg3[%c0_3, %c0_4] : memref<1x128xf32, #tpu.memory_space<vmem>>, vector<1x128xf32>
    %4 = vector.broadcast %3 : vector<1x128xf32> to vector<64x128xf32>
    %5 = arith.addf %2, %4 : vector<64x128xf32>
    %c0_5 = arith.constant 0 : index
    %c0_6 = arith.constant 0 : index
    %6 = vector.load %arg2[%c0_5, %c0_6] : memref<32x128xf32, #tpu.memory_space<vmem>>, vector<32x128xf32>
    %7 = tpu.iota {dimensions = array<i32: 1>} : vector<8x128xi32>
    %c64_i32 = arith.constant 64 : i32
    %8 = vector.broadcast %c64_i32 : i32 to vector<8x128xi32>
    %9 = arith.cmpi sge, %7, %8 : vector<8x128xi32>
    %c96_i32 = arith.constant 96 : i32
    %10 = vector.broadcast %c96_i32 : i32 to vector<8x128xi32>
    %11 = arith.cmpi slt, %7, %10 : vector<8x128xi32>
    %12 = arith.andi %9, %11 : vector<8x128xi1>
    %cst_7 = arith.constant 2.000000e+00 : f32
    %cst_8 = arith.constant 1.000000e+00 : f32
    %13 = vector.broadcast %cst_7 : f32 to vector<8x128xf32>
    %14 = vector.broadcast %cst_8 : f32 to vector<8x128xf32>
    %15 = arith.select %12, %13, %14 : vector<8x128xi1>, vector<8x128xf32>
    %cst_9 = arith.constant 0.000000e+00 : f32
    %16 = vector.broadcast %cst_9 : f32 to vector<8x32xf32>
    %cst_10 = arith.constant 0.000000e+00 : f32
    %17 = vector.broadcast %cst_10 : f32 to vector<8x32xf32>
    %cst_11 = arith.constant dense<0.000000e+00> : vector<8x128xf32>
    %18 = tpu.matmul %16, %6, %cst_11 {dimension_numbers = #tpu.dot_dimension_numbers<[1], [0], [0], [1], [0, 0, 1, 1], [], []>} : vector<8x32xf32>, vector<32x128xf32>, vector<8x128xf32> -> vector<8x128xf32>
    %19 = vector.extract_strided_slice %5 {offsets = [0, 0], sizes = [8, 128], strides = [1, 1]} : vector<64x128xf32> to vector<8x128xf32>
    %20 = arith.addf %18, %19 : vector<8x128xf32>
    %21 = arith.mulf %20, %15 : vector<8x128xf32>
    %22 = arith.negf %21 : vector<8x128xf32>
    %23 = math.exp %22 : vector<8x128xf32>
    %cst_12 = arith.constant 1.000000e+00 : f32
    %24 = vector.broadcast %cst_12 : f32 to vector<8x128xf32>
    %25 = arith.addf %24, %23 : vector<8x128xf32>
    %26 = arith.divf %24, %25 : vector<8x128xf32>
    %27 = vector.extract_strided_slice %26 {offsets = [0, 0], sizes = [8, 32], strides = [1, 1]} : vector<8x128xf32> to vector<8x32xf32>
    %28 = vector.extract_strided_slice %26 {offsets = [0, 32], sizes = [8, 32], strides = [1, 1]} : vector<8x128xf32> to vector<8x32xf32>
    %29 = vector.extract_strided_slice %26 {offsets = [0, 64], sizes = [8, 32], strides = [1, 1]} : vector<8x128xf32> to vector<8x32xf32>
    %cst_13 = arith.constant 2.000000e+00 : f32
    %30 = vector.broadcast %cst_13 : f32 to vector<8x32xf32>
    %31 = arith.mulf %30, %29 : vector<8x32xf32>
    %cst_14 = arith.constant 1.000000e+00 : f32
    %32 = vector.broadcast %cst_14 : f32 to vector<8x32xf32>
    %33 = arith.subf %31, %32 : vector<8x32xf32>
    %34 = vector.extract_strided_slice %26 {offsets = [0, 96], sizes = [8, 32], strides = [1, 1]} : vector<8x128xf32> to vector<8x32xf32>
    %35 = arith.mulf %28, %17 : vector<8x32xf32>
    %36 = arith.mulf %27, %33 : vector<8x32xf32>
    %37 = arith.addf %35, %36 : vector<8x32xf32>
    %38 = math.tanh %37 : vector<8x32xf32>
    %39 = arith.mulf %34, %38 : vector<8x32xf32>
    %cst_15 = arith.constant dense<0.000000e+00> : vector<8x128xf32>
    %40 = tpu.matmul %39, %6, %cst_15 {dimension_numbers = #tpu.dot_dimension_numbers<[1], [0], [0], [1], [0, 0, 1, 1], [], []>} : vector<8x32xf32>, vector<32x128xf32>, vector<8x128xf32> -> vector<8x128xf32>
    %41 = vector.extract_strided_slice %5 {offsets = [8, 0], sizes = [8, 128], strides = [1, 1]} : vector<64x128xf32> to vector<8x128xf32>
    %42 = arith.addf %40, %41 : vector<8x128xf32>
    %43 = arith.mulf %42, %15 : vector<8x128xf32>
    %44 = arith.negf %43 : vector<8x128xf32>
    %45 = math.exp %44 : vector<8x128xf32>
    %cst_16 = arith.constant 1.000000e+00 : f32
    %46 = vector.broadcast %cst_16 : f32 to vector<8x128xf32>
    %47 = arith.addf %46, %45 : vector<8x128xf32>
    %48 = arith.divf %46, %47 : vector<8x128xf32>
    %49 = vector.extract_strided_slice %48 {offsets = [0, 0], sizes = [8, 32], strides = [1, 1]} : vector<8x128xf32> to vector<8x32xf32>
    %50 = vector.extract_strided_slice %48 {offsets = [0, 32], sizes = [8, 32], strides = [1, 1]} : vector<8x128xf32> to vector<8x32xf32>
    %51 = vector.extract_strided_slice %48 {offsets = [0, 64], sizes = [8, 32], strides = [1, 1]} : vector<8x128xf32> to vector<8x32xf32>
    %cst_17 = arith.constant 2.000000e+00 : f32
    %52 = vector.broadcast %cst_17 : f32 to vector<8x32xf32>
    %53 = arith.mulf %52, %51 : vector<8x32xf32>
    %cst_18 = arith.constant 1.000000e+00 : f32
    %54 = vector.broadcast %cst_18 : f32 to vector<8x32xf32>
    %55 = arith.subf %53, %54 : vector<8x32xf32>
    %56 = vector.extract_strided_slice %48 {offsets = [0, 96], sizes = [8, 32], strides = [1, 1]} : vector<8x128xf32> to vector<8x32xf32>
    %57 = arith.mulf %50, %37 : vector<8x32xf32>
    %58 = arith.mulf %49, %55 : vector<8x32xf32>
    %59 = arith.addf %57, %58 : vector<8x32xf32>
    %60 = math.tanh %59 : vector<8x32xf32>
    %61 = arith.mulf %56, %60 : vector<8x32xf32>
    %cst_19 = arith.constant dense<0.000000e+00> : vector<8x128xf32>
    %62 = tpu.matmul %61, %6, %cst_19 {dimension_numbers = #tpu.dot_dimension_numbers<[1], [0], [0], [1], [0, 0, 1, 1], [], []>} : vector<8x32xf32>, vector<32x128xf32>, vector<8x128xf32> -> vector<8x128xf32>
    %63 = vector.extract_strided_slice %5 {offsets = [16, 0], sizes = [8, 128], strides = [1, 1]} : vector<64x128xf32> to vector<8x128xf32>
    %64 = arith.addf %62, %63 : vector<8x128xf32>
    %65 = arith.mulf %64, %15 : vector<8x128xf32>
    %66 = arith.negf %65 : vector<8x128xf32>
    %67 = math.exp %66 : vector<8x128xf32>
    %cst_20 = arith.constant 1.000000e+00 : f32
    %68 = vector.broadcast %cst_20 : f32 to vector<8x128xf32>
    %69 = arith.addf %68, %67 : vector<8x128xf32>
    %70 = arith.divf %68, %69 : vector<8x128xf32>
    %71 = vector.extract_strided_slice %70 {offsets = [0, 0], sizes = [8, 32], strides = [1, 1]} : vector<8x128xf32> to vector<8x32xf32>
    %72 = vector.extract_strided_slice %70 {offsets = [0, 32], sizes = [8, 32], strides = [1, 1]} : vector<8x128xf32> to vector<8x32xf32>
    %73 = vector.extract_strided_slice %70 {offsets = [0, 64], sizes = [8, 32], strides = [1, 1]} : vector<8x128xf32> to vector<8x32xf32>
    %cst_21 = arith.constant 2.000000e+00 : f32
    %74 = vector.broadcast %cst_21 : f32 to vector<8x32xf32>
    %75 = arith.mulf %74, %73 : vector<8x32xf32>
    %cst_22 = arith.constant 1.000000e+00 : f32
    %76 = vector.broadcast %cst_22 : f32 to vector<8x32xf32>
    %77 = arith.subf %75, %76 : vector<8x32xf32>
    %78 = vector.extract_strided_slice %70 {offsets = [0, 96], sizes = [8, 32], strides = [1, 1]} : vector<8x128xf32> to vector<8x32xf32>
    %79 = arith.mulf %72, %59 : vector<8x32xf32>
    %80 = arith.mulf %71, %77 : vector<8x32xf32>
    %81 = arith.addf %79, %80 : vector<8x32xf32>
    %82 = math.tanh %81 : vector<8x32xf32>
    %83 = arith.mulf %78, %82 : vector<8x32xf32>
    %cst_23 = arith.constant dense<0.000000e+00> : vector<8x128xf32>
    %84 = tpu.matmul %83, %6, %cst_23 {dimension_numbers = #tpu.dot_dimension_numbers<[1], [0], [0], [1], [0, 0, 1, 1], [], []>} : vector<8x32xf32>, vector<32x128xf32>, vector<8x128xf32> -> vector<8x128xf32>
    %85 = vector.extract_strided_slice %5 {offsets = [24, 0], sizes = [8, 128], strides = [1, 1]} : vector<64x128xf32> to vector<8x128xf32>
    %86 = arith.addf %84, %85 : vector<8x128xf32>
    %87 = arith.mulf %86, %15 : vector<8x128xf32>
    %88 = arith.negf %87 : vector<8x128xf32>
    %89 = math.exp %88 : vector<8x128xf32>
    %cst_24 = arith.constant 1.000000e+00 : f32
    %90 = vector.broadcast %cst_24 : f32 to vector<8x128xf32>
    %91 = arith.addf %90, %89 : vector<8x128xf32>
    %92 = arith.divf %90, %91 : vector<8x128xf32>
    %93 = vector.extract_strided_slice %92 {offsets = [0, 0], sizes = [8, 32], strides = [1, 1]} : vector<8x128xf32> to vector<8x32xf32>
    %94 = vector.extract_strided_slice %92 {offsets = [0, 32], sizes = [8, 32], strides = [1, 1]} : vector<8x128xf32> to vector<8x32xf32>
    %95 = vector.extract_strided_slice %92 {offsets = [0, 64], sizes = [8, 32], strides = [1, 1]} : vector<8x128xf32> to vector<8x32xf32>
    %cst_25 = arith.constant 2.000000e+00 : f32
    %96 = vector.broadcast %cst_25 : f32 to vector<8x32xf32>
    %97 = arith.mulf %96, %95 : vector<8x32xf32>
    %cst_26 = arith.constant 1.000000e+00 : f32
    %98 = vector.broadcast %cst_26 : f32 to vector<8x32xf32>
    %99 = arith.subf %97, %98 : vector<8x32xf32>
    %100 = vector.extract_strided_slice %92 {offsets = [0, 96], sizes = [8, 32], strides = [1, 1]} : vector<8x128xf32> to vector<8x32xf32>
    %101 = arith.mulf %94, %81 : vector<8x32xf32>
    %102 = arith.mulf %93, %99 : vector<8x32xf32>
    %103 = arith.addf %101, %102 : vector<8x32xf32>
    %104 = math.tanh %103 : vector<8x32xf32>
    %105 = arith.mulf %100, %104 : vector<8x32xf32>
    %cst_27 = arith.constant dense<0.000000e+00> : vector<8x128xf32>
    %106 = tpu.matmul %105, %6, %cst_27 {dimension_numbers = #tpu.dot_dimension_numbers<[1], [0], [0], [1], [0, 0, 1, 1], [], []>} : vector<8x32xf32>, vector<32x128xf32>, vector<8x128xf32> -> vector<8x128xf32>
    %107 = vector.extract_strided_slice %5 {offsets = [32, 0], sizes = [8, 128], strides = [1, 1]} : vector<64x128xf32> to vector<8x128xf32>
    %108 = arith.addf %106, %107 : vector<8x128xf32>
    %109 = arith.mulf %108, %15 : vector<8x128xf32>
    %110 = arith.negf %109 : vector<8x128xf32>
    %111 = math.exp %110 : vector<8x128xf32>
    %cst_28 = arith.constant 1.000000e+00 : f32
    %112 = vector.broadcast %cst_28 : f32 to vector<8x128xf32>
    %113 = arith.addf %112, %111 : vector<8x128xf32>
    %114 = arith.divf %112, %113 : vector<8x128xf32>
    %115 = vector.extract_strided_slice %114 {offsets = [0, 0], sizes = [8, 32], strides = [1, 1]} : vector<8x128xf32> to vector<8x32xf32>
    %116 = vector.extract_strided_slice %114 {offsets = [0, 32], sizes = [8, 32], strides = [1, 1]} : vector<8x128xf32> to vector<8x32xf32>
    %117 = vector.extract_strided_slice %114 {offsets = [0, 64], sizes = [8, 32], strides = [1, 1]} : vector<8x128xf32> to vector<8x32xf32>
    %cst_29 = arith.constant 2.000000e+00 : f32
    %118 = vector.broadcast %cst_29 : f32 to vector<8x32xf32>
    %119 = arith.mulf %118, %117 : vector<8x32xf32>
    %cst_30 = arith.constant 1.000000e+00 : f32
    %120 = vector.broadcast %cst_30 : f32 to vector<8x32xf32>
    %121 = arith.subf %119, %120 : vector<8x32xf32>
    %122 = vector.extract_strided_slice %114 {offsets = [0, 96], sizes = [8, 32], strides = [1, 1]} : vector<8x128xf32> to vector<8x32xf32>
    %123 = arith.mulf %116, %103 : vector<8x32xf32>
    %124 = arith.mulf %115, %121 : vector<8x32xf32>
    %125 = arith.addf %123, %124 : vector<8x32xf32>
    %126 = math.tanh %125 : vector<8x32xf32>
    %127 = arith.mulf %122, %126 : vector<8x32xf32>
    %cst_31 = arith.constant dense<0.000000e+00> : vector<8x128xf32>
    %128 = tpu.matmul %127, %6, %cst_31 {dimension_numbers = #tpu.dot_dimension_numbers<[1], [0], [0], [1], [0, 0, 1, 1], [], []>} : vector<8x32xf32>, vector<32x128xf32>, vector<8x128xf32> -> vector<8x128xf32>
    %129 = vector.extract_strided_slice %5 {offsets = [40, 0], sizes = [8, 128], strides = [1, 1]} : vector<64x128xf32> to vector<8x128xf32>
    %130 = arith.addf %128, %129 : vector<8x128xf32>
    %131 = arith.mulf %130, %15 : vector<8x128xf32>
    %132 = arith.negf %131 : vector<8x128xf32>
    %133 = math.exp %132 : vector<8x128xf32>
    %cst_32 = arith.constant 1.000000e+00 : f32
    %134 = vector.broadcast %cst_32 : f32 to vector<8x128xf32>
    %135 = arith.addf %134, %133 : vector<8x128xf32>
    %136 = arith.divf %134, %135 : vector<8x128xf32>
    %137 = vector.extract_strided_slice %136 {offsets = [0, 0], sizes = [8, 32], strides = [1, 1]} : vector<8x128xf32> to vector<8x32xf32>
    %138 = vector.extract_strided_slice %136 {offsets = [0, 32], sizes = [8, 32], strides = [1, 1]} : vector<8x128xf32> to vector<8x32xf32>
    %139 = vector.extract_strided_slice %136 {offsets = [0, 64], sizes = [8, 32], strides = [1, 1]} : vector<8x128xf32> to vector<8x32xf32>
    %cst_33 = arith.constant 2.000000e+00 : f32
    %140 = vector.broadcast %cst_33 : f32 to vector<8x32xf32>
    %141 = arith.mulf %140, %139 : vector<8x32xf32>
    %cst_34 = arith.constant 1.000000e+00 : f32
    %142 = vector.broadcast %cst_34 : f32 to vector<8x32xf32>
    %143 = arith.subf %141, %142 : vector<8x32xf32>
    %144 = vector.extract_strided_slice %136 {offsets = [0, 96], sizes = [8, 32], strides = [1, 1]} : vector<8x128xf32> to vector<8x32xf32>
    %145 = arith.mulf %138, %125 : vector<8x32xf32>
    %146 = arith.mulf %137, %143 : vector<8x32xf32>
    %147 = arith.addf %145, %146 : vector<8x32xf32>
    %148 = math.tanh %147 : vector<8x32xf32>
    %149 = arith.mulf %144, %148 : vector<8x32xf32>
    %cst_35 = arith.constant dense<0.000000e+00> : vector<8x128xf32>
    %150 = tpu.matmul %149, %6, %cst_35 {dimension_numbers = #tpu.dot_dimension_numbers<[1], [0], [0], [1], [0, 0, 1, 1], [], []>} : vector<8x32xf32>, vector<32x128xf32>, vector<8x128xf32> -> vector<8x128xf32>
    %151 = vector.extract_strided_slice %5 {offsets = [48, 0], sizes = [8, 128], strides = [1, 1]} : vector<64x128xf32> to vector<8x128xf32>
    %152 = arith.addf %150, %151 : vector<8x128xf32>
    %153 = arith.mulf %152, %15 : vector<8x128xf32>
    %154 = arith.negf %153 : vector<8x128xf32>
    %155 = math.exp %154 : vector<8x128xf32>
    %cst_36 = arith.constant 1.000000e+00 : f32
    %156 = vector.broadcast %cst_36 : f32 to vector<8x128xf32>
    %157 = arith.addf %156, %155 : vector<8x128xf32>
    %158 = arith.divf %156, %157 : vector<8x128xf32>
    %159 = vector.extract_strided_slice %158 {offsets = [0, 0], sizes = [8, 32], strides = [1, 1]} : vector<8x128xf32> to vector<8x32xf32>
    %160 = vector.extract_strided_slice %158 {offsets = [0, 32], sizes = [8, 32], strides = [1, 1]} : vector<8x128xf32> to vector<8x32xf32>
    %161 = vector.extract_strided_slice %158 {offsets = [0, 64], sizes = [8, 32], strides = [1, 1]} : vector<8x128xf32> to vector<8x32xf32>
    %cst_37 = arith.constant 2.000000e+00 : f32
    %162 = vector.broadcast %cst_37 : f32 to vector<8x32xf32>
    %163 = arith.mulf %162, %161 : vector<8x32xf32>
    %cst_38 = arith.constant 1.000000e+00 : f32
    %164 = vector.broadcast %cst_38 : f32 to vector<8x32xf32>
    %165 = arith.subf %163, %164 : vector<8x32xf32>
    %166 = vector.extract_strided_slice %158 {offsets = [0, 96], sizes = [8, 32], strides = [1, 1]} : vector<8x128xf32> to vector<8x32xf32>
    %167 = arith.mulf %160, %147 : vector<8x32xf32>
    %168 = arith.mulf %159, %165 : vector<8x32xf32>
    %169 = arith.addf %167, %168 : vector<8x32xf32>
    %170 = math.tanh %169 : vector<8x32xf32>
    %171 = arith.mulf %166, %170 : vector<8x32xf32>
    %cst_39 = arith.constant dense<0.000000e+00> : vector<8x128xf32>
    %172 = tpu.matmul %171, %6, %cst_39 {dimension_numbers = #tpu.dot_dimension_numbers<[1], [0], [0], [1], [0, 0, 1, 1], [], []>} : vector<8x32xf32>, vector<32x128xf32>, vector<8x128xf32> -> vector<8x128xf32>
    %173 = vector.extract_strided_slice %5 {offsets = [56, 0], sizes = [8, 128], strides = [1, 1]} : vector<64x128xf32> to vector<8x128xf32>
    %174 = arith.addf %172, %173 : vector<8x128xf32>
    %175 = arith.mulf %174, %15 : vector<8x128xf32>
    %176 = arith.negf %175 : vector<8x128xf32>
    %177 = math.exp %176 : vector<8x128xf32>
    %cst_40 = arith.constant 1.000000e+00 : f32
    %178 = vector.broadcast %cst_40 : f32 to vector<8x128xf32>
    %179 = arith.addf %178, %177 : vector<8x128xf32>
    %180 = arith.divf %178, %179 : vector<8x128xf32>
    %181 = vector.extract_strided_slice %180 {offsets = [0, 0], sizes = [8, 32], strides = [1, 1]} : vector<8x128xf32> to vector<8x32xf32>
    %182 = vector.extract_strided_slice %180 {offsets = [0, 32], sizes = [8, 32], strides = [1, 1]} : vector<8x128xf32> to vector<8x32xf32>
    %183 = vector.extract_strided_slice %180 {offsets = [0, 64], sizes = [8, 32], strides = [1, 1]} : vector<8x128xf32> to vector<8x32xf32>
    %cst_41 = arith.constant 2.000000e+00 : f32
    %184 = vector.broadcast %cst_41 : f32 to vector<8x32xf32>
    %185 = arith.mulf %184, %183 : vector<8x32xf32>
    %cst_42 = arith.constant 1.000000e+00 : f32
    %186 = vector.broadcast %cst_42 : f32 to vector<8x32xf32>
    %187 = arith.subf %185, %186 : vector<8x32xf32>
    %188 = vector.extract_strided_slice %180 {offsets = [0, 96], sizes = [8, 32], strides = [1, 1]} : vector<8x128xf32> to vector<8x32xf32>
    %189 = arith.mulf %182, %169 : vector<8x32xf32>
    %190 = arith.mulf %181, %187 : vector<8x32xf32>
    %191 = arith.addf %189, %190 : vector<8x32xf32>
    %192 = math.tanh %191 : vector<8x32xf32>
    %193 = arith.mulf %188, %192 : vector<8x32xf32>
    %c0_43 = arith.constant 0 : index
    %c0_44 = arith.constant 0 : index
    %194 = vector.load %arg4[%c0_43, %c0_44] : memref<32x128xf32, #tpu.memory_space<vmem>>, vector<32x128xf32>
    %cst_45 = arith.constant dense<0.000000e+00> : vector<8x128xf32>
    %195 = tpu.matmul %193, %194, %cst_45 {dimension_numbers = #tpu.dot_dimension_numbers<[1], [0], [0], [1], [0, 0, 1, 1], [], []>} : vector<8x32xf32>, vector<32x128xf32>, vector<8x128xf32> -> vector<8x128xf32>
    %c0_46 = arith.constant 0 : index
    %c0_47 = arith.constant 0 : index
    %196 = vector.load %arg5[%c0_46, %c0_47] : memref<1x128xf32, #tpu.memory_space<vmem>>, vector<1x128xf32>
    %197 = vector.broadcast %196 : vector<1x128xf32> to vector<8x128xf32>
    %198 = arith.addf %195, %197 : vector<8x128xf32>
    %c0_48 = arith.constant 0 : index
    %c0_49 = arith.constant 0 : index
    %199 = vector.load %arg6[%c0_48, %c0_49] : memref<8x128xf32, #tpu.memory_space<vmem>>, vector<8x128xf32>
    tpu.vector_store %arg6[%c0_48, %c0_49], %198 {strides = array<i32>} : memref<8x128xf32, #tpu.memory_space<vmem>>, vector<8x128xf32>,
    return
  }
}

</mosaic_0001>

<bundles_post_ra>
// kernel: tpu_custom_call.1
= control target key start
LH: loop header
LB: loop body
LE: loop exit
PB: predicated region body
PF: predicated region fallthrough
CT: control target
= control target key end

     0   :  { %vm41_vm0 = vcmask 130048   ;;  %v1430_v3 = vmov 0.0|0.0   ;;  %vm1431_vm1 = vmmov 0   ;;  %v1432_v10 = vmov 0.0   ;;  %s1681_s0 = inlined_call_operand.vmem [shape: f32[64,16], index: 0, kind: input, shape index: {}]   ;;  %s1682_s1 = inlined_call_operand.vmem [shape: f32[16,128], index: 1, kind: input, shape index: {}]   ;;  %s1683_s2 = inlined_call_operand.vmem [shape: f32[32,128], index: 2, kind: input, shape index: {}]   ;;  %s1684_s3 = inlined_call_operand.vmem [shape: f32[1,128], index: 3, kind: input, shape index: {}]   ;;  %s1685_s4 = inlined_call_operand.vmem [shape: f32[32,128], index: 4, kind: input, shape index: {}]   ;;  %s1686_s5 = inlined_call_operand.vmem [shape: f32[1,128], index: 5, kind: input, shape index: {}]   ;;  %s1687_s6 = inlined_call_operand.hbm [shape: f32[8,128], index: 6, kind: output, shape index: {}]  }
   0x1   :  { %v32_v0 = vld [vmem:[%s1682_s1] sm:$0xff]  ;;  %v33_v1 = vld [vmem:[%s1682_s1 + $0x8] sm:$0xff]  ;;  %1297 = vmatprep.subr.bf16.mxu1 %v1430_v3  ;;  %v173_v8 = vld [vmem:[%s1683_s2 + $0x10] sm:$0xff]  ;;  %1202 = vmatprep.mubr.msk.f32.mxu1 %vm1431_vm1, %v1432_v10 }
   0x2   :  { %v171_v2 = vld [vmem:[%s1683_s2] sm:$0xff]  ;;  %v1293_v4 = vpack.c.bf16 %v33_v1, %v32_v0  ;;  %v172_v5 = vld [vmem:[%s1683_s2 + $0x8] sm:$0xff]  ;;  %v174_v9 = vld [vmem:[%s1683_s2 + $0x18] sm:$0xff] }
   0x3   :  { %v24_v6 = vld [vmem:[%s1681_s0] sm:$0xff]  ;;  %v1488_v7 = vpack.c.bf16 %v172_v5, %v171_v2 }
   0x4   :  { %1182 = vmatprep.mubr.msk.f32.mxu0 %vm41_vm0, %v24_v6 }
   0x5   :  { %11 = vsyncpa [#allocation3], 0  ;;  %1294 = vmatprep.subr.bf16.mxu0 %v1293_v4  ;;  %1299 = vmatpush3.bf16.msra.mxu1 %v1488_v7  ;;  %v25_v11 = vld [vmem:[%s1681_s0 + $0x8] sm:$0xff]  ;;  %v1503_v12 = vpack.c.bf16 %v174_v9, %v173_v8  ;;  %v175_v13 = vlaneseq  ;;  %v1524_v15 = vld [vmem:[%s1684_s3] ss:$0 sm:$0xff]  ;;  %v1433_v19 = vmov 1.0  }
   0x6   :  { %1296 = vmatpush3.bf16.msra.mxu0 %v1293_v4  ;;  %1300 = vmatprep.subr.bf16.mxu1 %v1430_v3  ;;  %s1434_s3 = smov 64   ;;  %s1435_s13 = smov 32   ;;  %vm181_vm5 = vcmask 261120   ;;  %v26_v56 = vld [vmem:[%s1681_s0 + $0x10] sm:$0xff]  ;;  %v27_v57 = vld [vmem:[%s1681_s0 + $0x18] sm:$0xff]  ;;  %v28_v58 = vld [vmem:[%s1681_s0 + $0x20] sm:$0xff] }
   0x7   :  { %1309 = vmatprep.subr.bf16.mxu0 %v1430_v3  ;;  %v176_v14 = vand.u32 127, %v175_v13  ;;  %v29_v59 = vld [vmem:[%s1681_s0 + $0x28] sm:$0xff]  ;;  %v30_v60 = vld [vmem:[%s1681_s0 + $0x30] sm:$0xff]  ;;  %v31_v61 = vld [vmem:[%s1681_s0 + $0x38] sm:$0xff] }
   0x9   :  { %1183 = vmatmul.mubr.msk.f32.vlgmr.msra.gmra.mrb[0].mxu0 %vm41_vm0, %v25_v11  ;;  %1302 = vmatpush3.bf16.msra.mxu1 %v1503_v12  ;;  %vm177_vm2 = vcmp.ge.s32.totalorder %v176_v14, 64  ;;  %vm178_vm3 = vcmp.lt.s32.totalorder %v176_v14, 96 }
   0xa   :  { %1311 = vmatpush3.bf16.msra.mxu0 %v1488_v7  ;;  %1303 = vmatprep.subr.bf16.mxu1 %v1430_v3  ;;  %vm179_vm4 = vmand %vm177_vm2, %vm178_vm3 }
   0xb   :  { %1312 = vmatprep.subr.bf16.mxu0 %v1430_v3  ;;  %v1527_v20 = vsel %vm179_vm4, 2.0, %v1433_v19  ;;  %1185 = vmatprep.mubr.msk.f32.mxu0 %vm41_vm0, %v26_v56 }
   0xc   :  { %1203 = vmatmul.mubr.f32.vlgmr.msra.gmra.mrb[0].mxu1 %v1432_v10 }
   0xd   :  { %1305 = vmatpush3.bf16.msra.mxu1 %v1488_v7  ;;  %1213 = vmatprep.mubr.msk.f32.mxu1 %vm1431_vm1, %v1432_v10 }
   0xe   :  { %1306 = vmatprep.subr.bf16.mxu1 %v1430_v3  ;;  %1314 = vmatpush3.bf16.msra.mxu0 %v1503_v12 }
   0xf   :  { %1321 = vmatprep.subr.bf16.mxu0 %v1430_v3  ;;  %1186 = vmatmul.mubr.msk.f32.gmra.mrb[2].mxu0 %vm41_vm0, %v27_v57 }
  0x10   :  { %1188 = vmatprep.mubr.msk.f32.mxu0 %vm41_vm0, %v28_v58 }
  0x11   :  { %1308 = vmatpush3.bf16.msra.mxu1 %v1503_v12 }
  0x12   :  { %1315 = vmatprep.subr.bf16.mxu1 %v1430_v3 }
  0x13   :  { %1189 = vmatmul.mubr.msk.f32.gmra.mrb[4].mxu0 %vm41_vm0, %v29_v59 }
  0x14   :  { %1191 = vmatprep.mubr.msk.f32.mxu0 %vm41_vm0, %v30_v60 }
  0x17   :  { %1192 = vmatmul.mubr.msk.f32.gmra.mrb[6].mxu0 %vm41_vm0, %v31_v61 }
  0x18   :  { %1224 = vmatprep.mubr.msk.f32.mxu0 %vm1431_vm1, %v1432_v10 }
  0xdc   :  { %v1184_v16 = vpop.f32.mrb[0].mxu0 }
  0xdd   :  { %v132_v17 = vpop.f32.mrb[1].mxu0  ;;  %v138_v40 = vadd.f32 %v1184_v16, %v1524_v15 }
  0xde   :  { %v133_v18 = vadd.f32 %v1524_v15, %v132_v17 }
  0xdf   :  { %v251_v21 = vpop.f32.mrb[0].mxu1 }
  0xe0   :  { %v252_v22 = vadd.f32 %v251_v21, %v133_v18  ;;  %v1204_v23 = vpop.f32.mrb[1].mxu1 }
  0xe2   :  { %v255_v24 = vmul.f32 %v252_v22, %v1527_v20  ;;  %v1187_v1 = vpop.f32.mrb[2].mxu0 }
  0xe3   :  { %v142_v2 = vpop.f32.mrb[3].mxu0 }
  0xe4   :  { %v1098_v25 = vmul.f32 -1.442695, %v255_v24  ;;  %v143_v11 = vadd.f32 %v1524_v15, %v142_v2 }
  0xe6   :  { %1358 = vpow2.f32 %v1098_v25  ;;  %v1573_v4 = vpop.f32.mrb[4].mxu0 }
  0xe7   :  { %v1575_v5 = vpop.f32.mrb[5].mxu0 }
  0xea   :  { %v1577_v6 = vpop.f32.mrb[6].mxu0 }
  0xeb   :  { %v1579_v8 = vpop.f32.mrb[7].mxu0 }
  0xf0   :  { %v1359_v26 = vpop.eup %1358 }
  0xf1   :  { %v259_v27 = vadd.f32 1.0, %v1359_v26 }
  0xf3   :  { %1360 = vrcp.f32 %v259_v27 }
  0xfd   :  { %v1361_v28 = vpop.eup %1360 }
  0xfe   :  { %v262_v29 = vmul.f32 2.0, %v1361_v28  ;;  %v264_v33 = vmul.f32 0.0, %v1361_v28 }
 0x100   :  { %v1099_v30 = vadd.f32 -1.0, %v262_v29 }
 0x102   :  { %266 = vrot.lane.b32.xlu0 %v1099_v30, %s1434_s3 }
 0x174   :  { %v267_v31 = vpop.permute.xlu0 %266 }
 0x175   :  { %v269_v32 = vmul.f32 %v1361_v28, %v267_v31 }
 0x177   :  { %271 = vrot.lane.b32.xlu0 %v269_v32, %s1435_s13 }
 0x1e9   :  { %v272_v34 = vpop.permute.xlu0 %271 }
 0x1ea   :  { %v274_v35 = vadd.f32 %v272_v34, %v264_v33  ;;  %v148_v34 = vadd.f32 %v1187_v1, %v1524_v15 }
 0x1ec   :  { %1362 = vtanh.f32 %v274_v35 }
 0x1f6   :  { %v1363_v36 = vpop.eup %1362 }
 0x1f7   :  { %277 = vrot.lane.b32.xlu1 %v1363_v36, %s1434_s3 }
 0x269   :  { %v278_v37 = vpop.permute.xlu1 %277 }
 0x26a   :  { %v280_v38 = vmul.f32 %v1361_v28, %v278_v37 }
 0x26c   :  { %282 = vrot.lane.b32.xlu1 %v280_v38, %s1435_s13 }
 0x2de   :  { %v283_v39 = vpop.permute.xlu1 %282 }
 0x2df   :  { %1214 = vmatmul.mubr.msk.f32.vlgmr.msra.gmra.mrb[2].mxu1 %vm181_vm5, %v283_v39 }
 0x2e0   :  { %1317 = vmatpush3.bf16.msra.mxu1 %v1488_v7  ;;  %1235 = vmatprep.mubr.msk.f32.mxu1 %vm1431_vm1, %v1432_v10 }
 0x2e1   :  { %1318 = vmatprep.subr.bf16.mxu1 %v1430_v3 }
 0x2e4   :  { %1320 = vmatpush3.bf16.msra.mxu1 %v1503_v12 }
 0x2e5   :  { %1327 = vmatprep.subr.bf16.mxu1 %v1430_v3 }
 0x3b2   :  { %v352_v41 = vpop.f32.mrb[2].mxu1 }
 0x3b3   :  { %v353_v42 = vadd.f32 %v352_v41, %v138_v40  ;;  %v1215_v43 = vpop.f32.mrb[3].mxu1 }
 0x3b5   :  { %v356_v44 = vmul.f32 %v353_v42, %v1527_v20 }
 0x3b7   :  { %v1101_v45 = vmul.f32 -1.442695, %v356_v44 }
 0x3b9   :  { %1364 = vpow2.f32 %v1101_v45 }
 0x3c3   :  { %v1365_v46 = vpop.eup %1364 }
 0x3c4   :  { %v360_v47 = vadd.f32 1.0, %v1365_v46 }
 0x3c6   :  { %1366 = vrcp.f32 %v360_v47 }
 0x3d0   :  { %v1367_v48 = vpop.eup %1366 }
 0x3d1   :  { %v363_v49 = vmul.f32 2.0, %v1367_v48  ;;  %v365_v53 = vmul.f32 %v1367_v48, %v274_v35 }
 0x3d3   :  { %v1102_v50 = vadd.f32 -1.0, %v363_v49 }
 0x3d5   :  { %367 = vrot.lane.b32.xlu0 %v1102_v50, %s1434_s3 }
 0x447   :  { %v368_v51 = vpop.permute.xlu0 %367 }
 0x448   :  { %v370_v52 = vmul.f32 %v1367_v48, %v368_v51 }
 0x44a   :  { %372 = vrot.lane.b32.xlu1 %v370_v52, %s1435_s13 }
 0x4bc   :  { %v373_v54 = vpop.permute.xlu1 %372 }
 0x4bd   :  { %v375_v55 = vadd.f32 %v373_v54, %v365_v53  ;;  %v153_v54 = vadd.f32 %v1524_v15, %v1575_v5 }
 0x4bf   :  { %1368 = vtanh.f32 %v375_v55 }
 0x4c9   :  { %v1369_v62 = vpop.eup %1368 }
 0x4ca   :  { %378 = vrot.lane.b32.xlu0 %v1369_v62, %s1434_s3 }
 0x53c   :  { %v379_v63 = vpop.permute.xlu0 %378 }
 0x53d   :  { %v381_v0 = vmul.f32 %v1367_v48, %v379_v63 }
 0x53f   :  { %383 = vrot.lane.b32.xlu1 %v381_v0, %s1435_s13 }
 0x5b1   :  { %v384_v9 = vpop.permute.xlu1 %383 }
 0x5b2   :  { %1225 = vmatmul.mubr.msk.f32.vlgmr.msra.gmra.mrb[8].mxu0 %vm181_vm5, %v384_v9 }
 0x5b3   :  { %1323 = vmatpush3.bf16.msra.mxu0 %v1488_v7  ;;  %1246 = vmatprep.mubr.msk.f32.mxu0 %vm1431_vm1, %v1432_v10 }
 0x5b4   :  { %1324 = vmatprep.subr.bf16.mxu0 %v1430_v3 }
 0x5b7   :  { %1326 = vmatpush3.bf16.msra.mxu0 %v1503_v12 }
 0x5b8   :  { %1333 = vmatprep.subr.bf16.mxu0 %v1430_v3 }
 0x685   :  { %v453_v13 = vpop.f32.mrb[8].mxu0 }
 0x686   :  { %v454_v14 = vadd.f32 %v453_v13, %v143_v11  ;;  %v1226_v16 = vpop.f32.mrb[9].mxu0 }
 0x688   :  { %v457_v17 = vmul.f32 %v454_v14, %v1527_v20 }
 0x68a   :  { %v1104_v18 = vmul.f32 -1.442695, %v457_v17 }
 0x68c   :  { %1370 = vpow2.f32 %v1104_v18  ;;  %v158_v18 = vadd.f32 %v1573_v4, %v1524_v15 }
 0x696   :  { %v1371_v19 = vpop.eup %1370 }
 0x697   :  { %v461_v21 = vadd.f32 1.0, %v1371_v19 }
 0x699   :  { %1372 = vrcp.f32 %v461_v21 }
 0x6a3   :  { %v1373_v22 = vpop.eup %1372 }
 0x6a4   :  { %v464_v23 = vmul.f32 2.0, %v1373_v22  ;;  %v466_v27 = vmul.f32 %v1373_v22, %v375_v55 }
 0x6a6   :  { %v1105_v24 = vadd.f32 -1.0, %v464_v23 }
 0x6a8   :  { %468 = vrot.lane.b32.xlu0 %v1105_v24, %s1434_s3 }
 0x71a   :  { %v469_v25 = vpop.permute.xlu0 %468 }
 0x71b   :  { %v471_v26 = vmul.f32 %v1373_v22, %v469_v25 }
 0x71d   :  { %473 = vrot.lane.b32.xlu1 %v471_v26, %s1435_s13 }
 0x78f   :  { %v474_v28 = vpop.permute.xlu1 %473 }
 0x790   :  { %v476_v29 = vadd.f32 %v474_v28, %v466_v27 }
 0x792   :  { %1374 = vtanh.f32 %v476_v29 }
 0x79c   :  { %v1375_v30 = vpop.eup %1374 }
 0x79d   :  { %479 = vrot.lane.b32.xlu0 %v1375_v30, %s1434_s3 }
 0x80f   :  { %v480_v31 = vpop.permute.xlu0 %479 }
 0x810   :  { %v482_v32 = vmul.f32 %v1373_v22, %v480_v31 }
 0x812   :  { %484 = vrot.lane.b32.xlu1 %v482_v32, %s1435_s13 }
 0x884   :  { %v485_v33 = vpop.permute.xlu1 %484 }
 0x885   :  { %1236 = vmatmul.mubr.msk.f32.vlgmr.msra.gmra.mrb[4].mxu1 %vm181_vm5, %v485_v33 }
 0x886   :  { %1329 = vmatpush3.bf16.msra.mxu1 %v1488_v7  ;;  %1257 = vmatprep.mubr.msk.f32.mxu1 %vm1431_vm1, %v1432_v10 }
 0x887   :  { %1330 = vmatprep.subr.bf16.mxu1 %v1430_v3 }
 0x88a   :  { %1332 = vmatpush3.bf16.msra.mxu1 %v1503_v12 }
 0x88b   :  { %1339 = vmatprep.subr.bf16.mxu1 %v1430_v3 }
 0x958   :  { %v554_v35 = vpop.f32.mrb[4].mxu1 }
 0x959   :  { %v555_v36 = vadd.f32 %v554_v35, %v148_v34  ;;  %v1237_v37 = vpop.f32.mrb[5].mxu1 }
 0x95b   :  { %v558_v38 = vmul.f32 %v555_v36, %v1527_v20  ;;  %v163_v36 = vadd.f32 %v1524_v15, %v1579_v8 }
 0x95d   :  { %v1107_v39 = vmul.f32 -1.442695, %v558_v38 }
 0x95f   :  { %1376 = vpow2.f32 %v1107_v39 }
 0x969   :  { %v1377_v40 = vpop.eup %1376 }
 0x96a   :  { %v562_v41 = vadd.f32 1.0, %v1377_v40 }
 0x96c   :  { %1378 = vrcp.f32 %v562_v41 }
 0x976   :  { %v1379_v42 = vpop.eup %1378 }
 0x977   :  { %v565_v43 = vmul.f32 2.0, %v1379_v42  ;;  %v567_v47 = vmul.f32 %v1379_v42, %v476_v29 }
 0x979   :  { %v1108_v44 = vadd.f32 -1.0, %v565_v43 }
 0x97b   :  { %569 = vrot.lane.b32.xlu0 %v1108_v44, %s1434_s3 }
 0x9ed   :  { %v570_v45 = vpop.permute.xlu0 %569 }
 0x9ee   :  { %v572_v46 = vmul.f32 %v1379_v42, %v570_v45 }
 0x9f0   :  { %574 = vrot.lane.b32.xlu1 %v572_v46, %s1435_s13 }
 0xa62   :  { %v575_v48 = vpop.permute.xlu1 %574 }
 0xa63   :  { %v577_v49 = vadd.f32 %v575_v48, %v567_v47 }
 0xa65   :  { %1380 = vtanh.f32 %v577_v49 }
 0xa6f   :  { %v1381_v50 = vpop.eup %1380 }
 0xa70   :  { %580 = vrot.lane.b32.xlu0 %v1381_v50, %s1434_s3 }
 0xae2   :  { %v581_v51 = vpop.permute.xlu0 %580 }
 0xae3   :  { %v583_v52 = vmul.f32 %v1379_v42, %v581_v51 }
 0xae5   :  { %585 = vrot.lane.b32.xlu1 %v583_v52, %s1435_s13 }
 0xb57   :  { %v586_v53 = vpop.permute.xlu1 %585 }
 0xb58   :  { %1247 = vmatmul.mubr.msk.f32.vlgmr.msra.gmra.mrb[10].mxu0 %vm181_vm5, %v586_v53 }
 0xb59   :  { %1335 = vmatpush3.bf16.msra.mxu0 %v1488_v7  ;;  %1268 = vmatprep.mubr.msk.f32.mxu0 %vm1431_vm1, %v1432_v10 }
 0xb5a   :  { %1336 = vmatprep.subr.bf16.mxu0 %v1430_v3 }
 0xb5d   :  { %1338 = vmatpush3.bf16.msra.mxu0 %v1503_v12 }
 0xb5e   :  { %1345 = vmatprep.subr.bf16.mxu0 %v1430_v3 }
 0xc2b   :  { %v655_v55 = vpop.f32.mrb[10].mxu0 }
 0xc2c   :  { %v656_v56 = vadd.f32 %v655_v55, %v153_v54  ;;  %v1248_v57 = vpop.f32.mrb[11].mxu0  ;;  %v168_v54 = vadd.f32 %v1577_v6, %v1524_v15 }
 0xc2e   :  { %v659_v58 = vmul.f32 %v656_v56, %v1527_v20 }
 0xc30   :  { %v1110_v59 = vmul.f32 -1.442695, %v659_v58 }
 0xc32   :  { %1382 = vpow2.f32 %v1110_v59 }
 0xc3c   :  { %v1383_v60 = vpop.eup %1382 }
 0xc3d   :  { %v663_v61 = vadd.f32 1.0, %v1383_v60 }
 0xc3f   :  { %1384 = vrcp.f32 %v663_v61 }
 0xc49   :  { %v1385_v62 = vpop.eup %1384 }
 0xc4a   :  { %v666_v63 = vmul.f32 2.0, %v1385_v62  ;;  %v668_v5 = vmul.f32 %v1385_v62, %v577_v49 }
 0xc4c   :  { %v1111_v0 = vadd.f32 -1.0, %v666_v63 }
 0xc4e   :  { %670 = vrot.lane.b32.xlu0 %v1111_v0, %s1434_s3 }
 0xcc0   :  { %v671_v1 = vpop.permute.xlu0 %670 }
 0xcc1   :  { %v673_v2 = vmul.f32 %v1385_v62, %v671_v1 }
 0xcc3   :  { %675 = vrot.lane.b32.xlu1 %v673_v2, %s1435_s13 }
 0xd35   :  { %v676_v9 = vpop.permute.xlu1 %675 }
 0xd36   :  { %v678_v11 = vadd.f32 %v676_v9, %v668_v5  ;;  %v989_v9 = vld [vmem:[%s1685_s4 + $0x8] sm:$0xff] }
 0xd38   :  { %1386 = vtanh.f32 %v678_v11 }
 0xd42   :  { %v1387_v13 = vpop.eup %1386 }
 0xd43   :  { %681 = vrot.lane.b32.xlu0 %v1387_v13, %s1434_s3 }
 0xdb5   :  { %v682_v14 = vpop.permute.xlu0 %681 }
 0xdb6   :  { %v684_v16 = vmul.f32 %v1385_v62, %v682_v14  ;;  %v991_v14 = vld [vmem:[%s1685_s4 + $0x18] sm:$0xff] }
 0xdb8   :  { %686 = vrot.lane.b32.xlu1 %v684_v16, %s1435_s13 }
 0xe2a   :  { %v687_v17 = vpop.permute.xlu1 %686 }
 0xe2b   :  { %1258 = vmatmul.mubr.msk.f32.vlgmr.msra.gmra.mrb[6].mxu1 %vm181_vm5, %v687_v17 }
 0xe2c   :  { %1341 = vmatpush3.bf16.msra.mxu1 %v1488_v7  ;;  %1279 = vmatprep.mubr.msk.f32.mxu1 %vm1431_vm1, %v1432_v10 }
 0xe2d   :  { %1342 = vmatprep.subr.bf16.mxu1 %v1430_v3 }
 0xe30   :  { %1344 = vmatpush3.bf16.msra.mxu1 %v1503_v12 }
 0xefe   :  { %v756_v19 = vpop.f32.mrb[6].mxu1 }
 0xeff   :  { %v757_v21 = vadd.f32 %v756_v19, %v158_v18  ;;  %v1259_v22 = vpop.f32.mrb[7].mxu1 }
 0xf00   :  { %v1121_v22 = vld [vmem:[%s1686_s5] ss:$0 sm:$0xff] }
 0xf01   :  { %v760_v23 = vmul.f32 %v757_v21, %v1527_v20 }
 0xf03   :  { %v1113_v24 = vmul.f32 -1.442695, %v760_v23 }
 0xf05   :  { %1388 = vpow2.f32 %v1113_v24 }
 0xf0f   :  { %v1389_v25 = vpop.eup %1388 }
 0xf10   :  { %v764_v26 = vadd.f32 1.0, %v1389_v25 }
 0xf12   :  { %1390 = vrcp.f32 %v764_v26 }
 0xf1c   :  { %v1391_v7 = vpop.eup %1390 }
 0xf1d   :  { %v767_v27 = vmul.f32 2.0, %v1391_v7  ;;  %v769_v4 = vmul.f32 %v1391_v7, %v678_v11  ;;  %v990_v11 = vld [vmem:[%s1685_s4 + $0x10] sm:$0xff] }
 0xf1e   :  { %v1349_v16 = vpack.c.bf16 %v991_v14, %v990_v11 }
 0xf1f   :  { %v1114_v28 = vadd.f32 -1.0, %v767_v27 }
 0xf21   :  { %771 = vrot.lane.b32.xlu0 %v1114_v28, %s1434_s3 }
 0xf93   :  { %v772_v29 = vpop.permute.xlu0 %771 }
 0xf94   :  { %v774_v12 = vmul.f32 %v1391_v7, %v772_v29 }
 0xf96   :  { %776 = vrot.lane.b32.xlu1 %v774_v12, %s1435_s13 }
0x1008   :  { %v777_v30 = vpop.permute.xlu1 %776 }
0x1009   :  { %v779_v31 = vadd.f32 %v777_v30, %v769_v4 }
0x100b   :  { %1392 = vtanh.f32 %v779_v31 }
0x1015   :  { %v1393_v32 = vpop.eup %1392 }
0x1016   :  { %782 = vrot.lane.b32.xlu0 %v1393_v32, %s1434_s3 }
0x1088   :  { %v783_v33 = vpop.permute.xlu0 %782 }
0x1089   :  { %v785_v34 = vmul.f32 %v1391_v7, %v783_v33 }
0x108b   :  { %787 = vrot.lane.b32.xlu1 %v785_v34, %s1435_s13 }
0x10fd   :  { %v788_v35 = vpop.permute.xlu1 %787 }
0x10fe   :  { %1269 = vmatmul.mubr.msk.f32.vlgmr.msra.gmra.mrb[12].mxu0 %vm181_vm5, %v788_v35 }
0x10ff   :  { %1290 = vmatprep.mubr.msk.f32.mxu0 %vm1431_vm1, %v1432_v10 }
0x11d1   :  { %v857_v37 = vpop.f32.mrb[12].mxu0 }
0x11d2   :  { %v858_v38 = vadd.f32 %v857_v37, %v163_v36  ;;  %v1270_v39 = vpop.f32.mrb[13].mxu0 }
0x11d4   :  { %v861_v40 = vmul.f32 %v858_v38, %v1527_v20 }
0x11d6   :  { %v1116_v41 = vmul.f32 -1.442695, %v861_v40 }
0x11d8   :  { %1394 = vpow2.f32 %v1116_v41 }
0x11e2   :  { %v1395_v42 = vpop.eup %1394 }
0x11e3   :  { %v865_v43 = vadd.f32 1.0, %v1395_v42 }
0x11e5   :  { %1396 = vrcp.f32 %v865_v43 }
0x11ef   :  { %v1397_v44 = vpop.eup %1396 }
0x11f0   :  { %v868_v45 = vmul.f32 2.0, %v1397_v44  ;;  %v870_v8 = vmul.f32 %v1397_v44, %v779_v31 }
0x11f2   :  { %v1117_v46 = vadd.f32 -1.0, %v868_v45 }
0x11f4   :  { %872 = vrot.lane.b32.xlu0 %v1117_v46, %s1434_s3 }
0x1266   :  { %v873_v47 = vpop.permute.xlu0 %872 }
0x1267   :  { %v875_v10 = vmul.f32 %v1397_v44, %v873_v47 }
0x1269   :  { %877 = vrot.lane.b32.xlu1 %v875_v10, %s1435_s13 }
0x12db   :  { %v878_v48 = vpop.permute.xlu1 %877 }
0x12dc   :  { %v880_v49 = vadd.f32 %v878_v48, %v870_v8 }
0x12de   :  { %1398 = vtanh.f32 %v880_v49 }
0x12e8   :  { %v1399_v50 = vpop.eup %1398 }
0x12e9   :  { %883 = vrot.lane.b32.xlu0 %v1399_v50, %s1434_s3 }
0x135b   :  { %v884_v51 = vpop.permute.xlu0 %883 }
0x135c   :  { %v886_v52 = vmul.f32 %v1397_v44, %v884_v51 }
0x135e   :  { %888 = vrot.lane.b32.xlu1 %v886_v52, %s1435_s13 }
0x13d0   :  { %v889_v53 = vpop.permute.xlu1 %888 }
0x13d1   :  { %1280 = vmatmul.mubr.msk.f32.vlgmr.msra.gmra.mrb[8].mxu1 %vm181_vm5, %v889_v53 }
0x14a4   :  { %v958_v55 = vpop.f32.mrb[8].mxu1 }
0x14a5   :  { %v959_v56 = vadd.f32 %v958_v55, %v168_v54  ;;  %v1281_v57 = vpop.f32.mrb[9].mxu1 }
0x14a7   :  { %v962_v58 = vmul.f32 %v959_v56, %v1527_v20  ;;  %v988_v20 = vld [vmem:[%s1685_s4] sm:$0xff]  ;;  %s1436_s4 = smov [#allocation2]  }
0x14a8   :  { %v1346_v13 = vpack.c.bf16 %v989_v9, %v988_v20  ;;  %s1081_s10 = sshll.u32 %s1436_s4, 4  ;;  %s1082_s10 = int_to_ptr.vmem [resolvable:$true] %s1081_s10 }
0x14a9   :  { %v1119_v59 = vmul.f32 -1.442695, %v962_v58  ;;  %s1406_s11 = scalar_lea.vmem %s1082_s10, 128  ;;  %p1411_p1 = scmp.lt.s32.totalorder %s1082_s10, %s1082_s10 }
0x14aa   :  { %1347 = vmatpush3.bf16.msra.mxu0 %v1346_v13  ;;  %p1407_p0 = scmp.ne.s32.totalorder %s1082_s10, %s1406_s11  ;;  %p1412_p2 = scmp.lt.s32.totalorder %s1406_s11, %s1406_s11 }
0x14ab   :  { %1400 = vpow2.f32 %v1119_v59  ;;  %1348 = vmatprep.subr.bf16.mxu0 %v1430_v3 }
0x14ac   :  { %p1413_p3 = por %p1412_p2, %p1411_p1 }
0x14ae   :  { %1350 = vmatpush3.bf16.msra.mxu0 %v1349_v16  ;;  %p1414_p4 = pnand %p1413_p3, %p1407_p0 }
0x14b5   :  { %v1401_v60 = vpop.eup %1400 }
0x14b6   :  { %v966_v61 = vadd.f32 1.0, %v1401_v60 }
0x14b8   :  { %1402 = vrcp.f32 %v966_v61 }
0x14c2   :  { %v1403_v62 = vpop.eup %1402 }
0x14c3   :  { %v969_v63 = vmul.f32 2.0, %v1403_v62  ;;  %v971_v15 = vmul.f32 %v1403_v62, %v880_v49 }
0x14c5   :  { %v1120_v0 = vadd.f32 -1.0, %v969_v63 }
0x14c7   :  { %973 = vrot.lane.b32.xlu0 %v1120_v0, %s1434_s3 }
0x1539   :  { %v974_v1 = vpop.permute.xlu0 %973 }
0x153a   :  { %v976_v2 = vmul.f32 %v1403_v62, %v974_v1 }
0x153c   :  { %978 = vrot.lane.b32.xlu1 %v976_v2, %s1435_s13 }
0x15ae   :  { %v979_v6 = vpop.permute.xlu1 %978 }
0x15af   :  { %v981_v5 = vadd.f32 %v979_v6, %v971_v15 }
0x15b1   :  { %1404 = vtanh.f32 %v981_v5 }
0x15bb   :  { %v1405_v17 = vpop.eup %1404 }
0x15bc   :  { %984 = vrot.lane.b32.xlu0 %v1405_v17, %s1434_s3 }
0x162e   :  { %v985_v18 = vpop.permute.xlu0 %984 }
0x162f   :  { %v987_v19 = vmul.f32 %v1403_v62, %v985_v18 }
0x1631   :  { %1000 = vrot.lane.b32.xlu1 %v987_v19, %s1435_s13 }
0x16a3   :  { %v1001_v21 = vpop.permute.xlu1 %1000 }
0x16a4   :  { %1291 = vmatmul.mubr.msk.f32.vlgmr.msra.gmra.mrb[14].mxu0 %vm181_vm5, %v1001_v21 }
0x1777   :  { %v1070_v23 = vpop.f32.mrb[14].mxu0 }
0x1778   :  { %v1071_v24 = vadd.f32 %v1121_v22, %v1070_v23  ;;  %v1292_v3 = vpop.f32.mrb[15].mxu0 }
0x177a   :  { %1074 = vst [vmem:[#allocation2] sm:$0xff] %v1071_v24 }
0x177b   :  { %1417 = shalt.err (!%p1414_p4)
}
0x177c   :  { %s1418_s3 = scalar_lea.hbm %s1687_s6, 128 }
0x177d   :  { %p1419_p5 = scmp.ne.s32.totalorder %s1687_s6, %s1418_s3  ;;  %p1422_p6 = scmp.lt.u32.totalorder %s1418_s3, %s1687_s6 }
0x177f   :  { %p1424_p7 = pnand %p1422_p6, %p1419_p5 }
0x1781   :  { %1427 = shalt.err (!%p1424_p7)
}
0x1782   :  { %1084 = dma.vmem_to_hbm [thread:$0]  %s1082_s10, 128, %s1687_s6, [#allocation3]  }
0x1783   :  { %1428 = dma.done.wait [#allocation3], 128  }
0x1784   :  { %1429 = vsyncadd [#allocation3], 4294967168 }
0x1785   :  { %1088 = vsyncpa [#allocation3], 1 }

</bundles_post_ra>
